<compile_context>
chip_gen: v6e
topology: v6e:2x2x1
jax: 0.10.0
libtpu: 0.0.40
codegen_flags: <defaults>
</compile_context>

<pallas_src>
import functools

import jax
import jax.numpy as jnp
from jax.experimental import pallas as pl
from jax.experimental.pallas import tpu as pltpu


def _vmem_limit_bytes():
    """Generation-aware scoped-VMEM limit: ~96 MiB on v5e/v6e, ~48 MiB on v7x."""
    try:
        cap = int(pltpu.get_tpu_info().vmem_capacity_bytes)
    except Exception:
        cap = 64 * 1024 * 1024
    return int(max(32 * 1024 * 1024, min(cap * 3 // 4, 100 * 1024 * 1024)))


# ----------------------------------------------------------------------------------
# emb MLP:  emb_out = SiLU(emb) @ W + b     (single MXU pass, everything VMEM-resident)
# ----------------------------------------------------------------------------------
def _emb_linear_kernel(e_ref, w_ref, b_ref, o_ref):
    e = e_ref[...].astype(jnp.float32)
    act = e * (1.0 / (1.0 + jnp.exp(-e)))            # exact SiLU (no approx recip)
    acc = jnp.dot(act.astype(w_ref.dtype), w_ref[...],
                  preferred_element_type=jnp.float32)
    o_ref[...] = (acc + b_ref[...].astype(jnp.float32)).astype(o_ref.dtype)


def pallas_emb_linear(emb, w, b):
    """emb:(B,E)  w:(E,2C)  b:(2C,)  ->  (B,2C) float32 (scale/shift kept full precision)."""
    M, K = emb.shape
    K2, N = w.shape
    assert K == K2 and b.shape == (N,)
    # TODO(synk): for emb_dim / 2*C too large for a single VMEM block, re-introduce a
    # K/N-tiled matmul; for AdaGN's embedding MLP (B small, E<=512) one block is optimal.
    return pl.pallas_call(
        _emb_linear_kernel,
        out_shape=jax.ShapeDtypeStruct((M, N), jnp.float32),
        grid=(1,),
        in_specs=[
            pl.BlockSpec((M, K), lambda i: (0, 0)),
            pl.BlockSpec((K, N), lambda i: (0, 0)),
            pl.BlockSpec((1, N), lambda i: (0, 0)),
        ],
        out_specs=pl.BlockSpec((M, N), lambda i: (0, 0)),
        compiler_params=pltpu.CompilerParams(vmem_limit_bytes=_vmem_limit_bytes()),
    )(emb, w, b.reshape(1, N))


# ----------------------------------------------------------------------------------
# Fused GroupNorm (affine) + AdaGN modulation:  y = GN(x)*gamma+beta, out = y*(1+scale)+shift
# ----------------------------------------------------------------------------------
def _adagn_kernel(x_ref, gb_ref, ss_ref, o_ref, *, groups_per_blk, cg, eps, inv_n):
    # x_ref : (1, C_blk, L)   -- C_blk = groups_per_blk * cg whole groups
    # gb_ref: (2, C_blk, 1)   -- [0]=gamma, [1]=beta
    # ss_ref: (1, 2, C_blk, 1)-- [0,0]=scale, [0,1]=shift (per batch row)
    for g in range(groups_per_blk):                       # unrolled, static slices
        lo = g * cg
        hi = lo + cg
        xg = x_ref[0, lo:hi, :].astype(jnp.float32)        # (cg, L)
        mean = jnp.sum(xg, keepdims=True) * inv_n          # (1, 1)
        d = xg - mean
        var = jnp.sum(d * d, keepdims=True) * inv_n        # (1, 1)
        y = d * jax.lax.rsqrt(var + eps)
        gam = gb_ref[0, lo:hi, :].astype(jnp.float32)      # (cg, 1)
        bet = gb_ref[1, lo:hi, :].astype(jnp.float32)
        sc = ss_ref[0, 0, lo:hi, :].astype(jnp.float32)    # (cg, 1)
        sh = ss_ref[0, 1, lo:hi, :].astype(jnp.float32)
        y = y * gam + bet                                  # GroupNorm affine
        o_ref[0, lo:hi, :] = (y * (1.0 + sc) + sh).astype(o_ref.dtype)


def _pick_groups_per_block(G, Cg, L, io_bytes_per_elem, budget_bytes):
    """Largest #groups per block whose double-buffered in+out fits the VMEM budget,
    subject to the (8,128) sublane rule (C_blk % 8 == 0 or C_blk == C)."""
    per_group = Cg * L * io_bytes_per_elem
    legal = [g for g in range(G, 0, -1)
             if G % g == 0 and (g == G or (g * Cg) % 8 == 0)]
    for g in legal:
        if 2 * g * per_group <= budget_bytes:
            return g
    return legal[-1]


def pallas_adagn_norm(x, gamma, beta, emb_out, num_groups, *, eps=1e-5):
    """GroupNorm + gamma/beta + x*(1+scale)+shift, fused in one kernel.

    x: (B, C, L); gamma/beta: (C,); emb_out: (B, 2C) -- first C = scale, last C = shift.
    Output dtype follows x.dtype (bf16 callers get bf16 HBM traffic); math is f32.
    """
    B, C, L = x.shape
    G = num_groups
    assert C % G == 0
    Cg = C // G
    out_dtype = x.dtype

    vmem_limit = _vmem_limit_bytes()
    io_bytes = x.dtype.itemsize + jnp.dtype(out_dtype).itemsize
    gpb = _pick_groups_per_block(G, Cg, L, io_bytes, int(0.8 * vmem_limit))
    n_gt = G // gpb                     # group-tiles per batch item
    C_blk = gpb * Cg
    # TODO(synk): for extremely long L where even one group exceeds the VMEM budget,
    # add an L-tiled two-pass (sum / sum-sq scratch over an 'arbitrary' L axis).

    # Pack tiny side inputs once (VMEM-resident small blocks, one DMA each).
    gb = jnp.stack([gamma, beta]).reshape(2, C, 1).astype(jnp.float32)
    ss = emb_out.reshape(B, 2, C, 1).astype(jnp.float32)

    kern = functools.partial(_adagn_kernel, groups_per_blk=gpb, cg=Cg,
                             eps=float(eps), inv_n=1.0 / (Cg * L))
    x_spec = pl.BlockSpec((1, C_blk, L), lambda b, ct: (b, ct, 0))
    gb_spec = pl.BlockSpec((2, C_blk, 1), lambda b, ct: (0, ct, 0))
    ss_spec = pl.BlockSpec((1, 2, C_blk, 1), lambda b, ct: (b, 0, ct, 0))

    return pl.pallas_call(
        kern,
        out_shape=jax.ShapeDtypeStruct((B, C, L), out_dtype),
        grid=(B, n_gt),
        in_specs=[x_spec, gb_spec, ss_spec],
        out_specs=x_spec,
        compiler_params=pltpu.CompilerParams(
            dimension_semantics=("parallel", "parallel"),
            vmem_limit_bytes=vmem_limit,
        ),
    )(x, gb, ss)


# ----------------------------------------------------------------------------------
# AdaGN forward (matches the PyTorch module)
# ----------------------------------------------------------------------------------
def adagn_forward(params, x, emb, num_groups, eps=1e-5):
    # emb_layers = SiLU -> Linear(emb_dim, 2*C), SiLU fused into the matmul kernel.
    emb_out = pallas_emb_linear(emb, params["emb_w"], params["emb_b"])
    # GroupNorm + affine + AdaGN modulation fused into one kernel.
    return pallas_adagn_norm(x, params["gamma"], params["beta"], emb_out,
                             num_groups, eps=eps)


# ----------------------------------------------------------------------------------
if __name__ == "__main__":
    key = jax.random.PRNGKey(0)
    k1, k2, k3, k4, k5, k6 = jax.random.split(key, 6)

    B, C, L = 2, 32, 128      # (batch, channels, length); L=128 -> lane-dense output
    G = 8                     # num_groups
    E = 64                    # time-embedding dim

    x = jax.random.normal(k1, (B, C, L), jnp.float32)
    emb = jax.random.normal(k2, (B, E), jnp.float32)

    params = {
        "gamma": 1.0 + 0.1 * jax.random.normal(k3, (C,), jnp.float32),
        "beta": 0.1 * jax.random.normal(k4, (C,), jnp.float32),
        "emb_w": 0.05 * jax.random.normal(k5, (E, 2 * C), jnp.float32),
        "emb_b": 0.05 * jax.random.normal(k6, (2 * C,), jnp.float32),
    }

    out = adagn_forward(params, x, emb, G)
    out = jax.block_until_ready(out)

    # Pure-JAX reference (PyTorch semantics).
    def reference(x, emb, p, num_groups, eps=1e-5):
        Bb, Cc, Ll = x.shape
        xg = x.reshape(Bb, num_groups, -1)
        mean = xg.mean(axis=2, keepdims=True)
        var = ((xg - mean) ** 2).mean(axis=2, keepdims=True)
        xn = ((xg - mean) / jnp.sqrt(var + eps)).reshape(Bb, Cc, Ll)
        xn = xn * p["gamma"][None, :, None] + p["beta"][None, :, None]
        e = jax.nn.silu(emb) @ p["emb_w"] + p["emb_b"]
        scale, shift = e[:, :Cc], e[:, Cc:]
        return xn * (1.0 + scale[:, :, None]) + shift[:, :, None]

    expected = reference(x, emb, params, G)
    assert out.shape == (B, C, L), out.shape
    assert bool(jnp.all(jnp.isfinite(out)))
    max_err = float(jnp.max(jnp.abs(out - expected)))
    assert jnp.allclose(out, expected, atol=2e-3, rtol=2e-3), max_err
    print("KERNEL_OK")
</pallas_src>

<mosaic_0001>
module attributes {stable_mosaic.version = 11 : i64} {
  func.func @_emb_linear_kernel(%arg0: i32, %arg1: memref<2x64xf32, #tpu.memory_space<vmem>>, %arg2: memref<64x64xf32, #tpu.memory_space<vmem>>, %arg3: memref<1x64xf32, #tpu.memory_space<vmem>>, %arg4: memref<2x64xf32, #tpu.memory_space<vmem>>) attributes {dimension_semantics = [#tpu.dimension_semantics<arbitrary>], iteration_bounds = array<i64: 1>, scalar_prefetch = 0 : i64, scratch_operands = 0 : i64, tpu.core_type = #tpu.core_type<tc>, window_params = [{pipeline_mode = #tpu.pipeline_mode<synchronous>, transform_indices = @transform_0, window_bounds = array<i64: 2, 64>}, {pipeline_mode = #tpu.pipeline_mode<synchronous>, transform_indices = @transform_1, window_bounds = array<i64: 64, 64>}, {pipeline_mode = #tpu.pipeline_mode<synchronous>, transform_indices = @transform_2, window_bounds = array<i64: 1, 64>}, {pipeline_mode = #tpu.pipeline_mode<synchronous>, transform_indices = @transform_3, window_bounds = array<i64: 2, 64>}]} {
    %c0 = arith.constant 0 : index
    %c0_0 = arith.constant 0 : index
    %0 = vector.load %arg1[%c0, %c0_0] : memref<2x64xf32, #tpu.memory_space<vmem>>, vector<2x64xf32>
    %cst = arith.constant 0.000000e+00 : f32
    %1 = vector.broadcast %cst : f32 to vector<2x64xf32>
    %2 = arith.subf %1, %0 : vector<2x64xf32>
    %3 = math.exp %2 : vector<2x64xf32>
    %cst_1 = arith.constant 1.000000e+00 : f32
    %4 = vector.broadcast %cst_1 : f32 to vector<2x64xf32>
    %5 = arith.addf %4, %3 : vector<2x64xf32>
    %cst_2 = arith.constant 1.000000e+00 : f32
    %6 = vector.broadcast %cst_2 : f32 to vector<2x64xf32>
    %7 = arith.divf %6, %5 : vector<2x64xf32>
    %8 = arith.mulf %0, %7 : vector<2x64xf32>
    %c0_3 = arith.constant 0 : index
    %c0_4 = arith.constant 0 : index
    %9 = vector.load %arg2[%c0_3, %c0_4] : memref<64x64xf32, #tpu.memory_space<vmem>>, vector<64x64xf32>
    %cst_5 = arith.constant dense<0.000000e+00> : vector<2x64xf32>
    %10 = tpu.matmul %8, %9, %cst_5 {dimension_numbers = #tpu.dot_dimension_numbers<[1], [0], [0], [1], [0, 0, 1, 1], [], []>} : vector<2x64xf32>, vector<64x64xf32>, vector<2x64xf32> -> vector<2x64xf32>
    %c0_6 = arith.constant 0 : index
    %c0_7 = arith.constant 0 : index
    %11 = vector.load %arg3[%c0_6, %c0_7] : memref<1x64xf32, #tpu.memory_space<vmem>>, vector<1x64xf32>
    %12 = vector.broadcast %11 : vector<1x64xf32> to vector<2x64xf32>
    %13 = arith.addf %10, %12 : vector<2x64xf32>
    %c0_8 = arith.constant 0 : index
    %c0_9 = arith.constant 0 : index
    %14 = vector.load %arg4[%c0_8, %c0_9] : memref<2x64xf32, #tpu.memory_space<vmem>>, vector<2x64xf32>
    tpu.vector_store %arg4[%c0_8, %c0_9], %13 {strides = array<i32>} : memref<2x64xf32, #tpu.memory_space<vmem>>, vector<2x64xf32>,
    return
  }
  func.func @transform_0(%arg0: i32) -> (i32, i32) {
    %c0_i32 = arith.constant 0 : i32
    %c0_i32_0 = arith.constant 0 : i32
    %c0_i32_1 = arith.constant 0 : i32
    return %c0_i32, %c0_i32_0 : i32, i32
  }
  func.func @transform_1(%arg0: i32) -> (i32, i32) {
    %c0_i32 = arith.constant 0 : i32
    %c0_i32_0 = arith.constant 0 : i32
    %c0_i32_1 = arith.constant 0 : i32
    return %c0_i32, %c0_i32_0 : i32, i32
  }
  func.func @transform_2(%arg0: i32) -> (i32, i32) {
    %c0_i32 = arith.constant 0 : i32
    %c0_i32_0 = arith.constant 0 : i32
    %c0_i32_1 = arith.constant 0 : i32
    return %c0_i32, %c0_i32_0 : i32, i32
  }
  func.func @transform_3(%arg0: i32) -> (i32, i32) {
    %c0_i32 = arith.constant 0 : i32
    %c0_i32_0 = arith.constant 0 : i32
    %c0_i32_1 = arith.constant 0 : i32
    return %c0_i32, %c0_i32_0 : i32, i32
  }
}

</mosaic_0001>

<bundles_post_ra>
// kernel: tpu_custom_call.1
= control target key start
LH: loop header
LB: loop body
LE: loop exit
PB: predicated region body
PF: predicated region fallthrough
CT: control target
= control target key end

     0   :  { %8 = vsyncpa [#allocation3], 0  ;;  %s302_s0 = inlined_call_operand.hbm [shape: f32[2,64], index: 0, kind: input, shape index: {}]   ;;  %s303_s1 = inlined_call_operand.hbm [shape: f32[64,64], index: 1, kind: input, shape index: {}]   ;;  %s304_s2 = inlined_call_operand.vmem [shape: f32[1,64], index: 2, kind: input, shape index: {}]   ;;  %s305_s3 = inlined_call_operand.hbm [shape: f32[2,64], index: 3, kind: output, shape index: {}]  }
   0x1   :  { %9 = vsyncpa [#allocation6], 0 }
   0x2   :  { %10 = vsyncpa [#allocation4], 0  ;;  %s263_s12 = smov [#allocation2]   ;;  %s264_s14 = smov [#allocation5]  }
   0x3   :  { %s17_s13 = sshll.u32 %s263_s12, 4  ;;  %s26_s15 = sshll.u32 %s264_s14, 4  ;;  %s18_s13 = int_to_ptr.vmem [resolvable:$true] %s17_s13  ;;  %s27_s15 = int_to_ptr.vmem [resolvable:$true] %s26_s15 }
   0x4   :  { %s205_s16 = scalar_lea.vmem %s18_s13, 32  ;;  %p210_p1 = scmp.lt.s32.totalorder %s18_s13, %s18_s13 }
   0x5   :  { %p206_p0 = scmp.ne.s32.totalorder %s18_s13, %s205_s16  ;;  %p211_p2 = scmp.lt.s32.totalorder %s205_s16, %s205_s16 }
   0x7   :  { %p212_p3 = por %p211_p2, %p210_p1 }
   0x9   :  { %p213_p4 = pnand %p212_p3, %p206_p0 }
   0xb   :  { %216 = shalt.err (!%p213_p4)
}
   0xc   :  { %20 = dma.hbm_to_vmem [thread:$0]  %s302_s0, 32, %s18_s13, [#allocation3]  }
   0xd   :  { %s225_s19 = scalar_lea.vmem %s27_s15, 1024  ;;  %p230_p6 = scmp.lt.s32.totalorder %s27_s15, %s27_s15 }
   0xe   :  { %p226_p5 = scmp.ne.s32.totalorder %s27_s15, %s225_s19  ;;  %p231_p7 = scmp.lt.s32.totalorder %s225_s19, %s225_s19 }
  0x10   :  { %p232_p8 = por %p231_p7, %p230_p6 }
  0x12   :  { %p233_p9 = pnand %p232_p8, %p226_p5 }
  0x14   :  { %236 = shalt.err (!%p233_p9)
}
  0x15   :  { %s265_s20 = smov 128   ;;  %s266_s21 = smov 8  }
  0x16   :  { %32 = dma.hbm_to_vmem [thread:$0]  %s303_s1, 1024, %s27_s15, [#allocation6], %s265_s20, %s265_s20, %s266_s21  }
  0x17   :  { %257 = dma.done.wait [#allocation3], 32  }
  0x18   :  { %258 = vsyncadd [#allocation3], 4294967264 }
  0x19   :  { %259 = dma.done.wait [#allocation6], 1024  }
  0x1a   :  { %260 = vsyncadd [#allocation6], 4294966272  ;;  %v267_v0 = vmov 0.0   ;;  %vm268_vm0 = vmmov 0   ;;  %v56_v1 = vld [vmem:[#allocation5 + $0x38] sm:$0xff]  ;;  %v55_v2 = vld [vmem:[#allocation5 + $0x30] sm:$0xff] }
  0x1b   :  { %167 = vmatprep.subr.mxu0 %v267_v0  ;;  %183 = vmatprep.mubr.msk.f32.mxu0 %vm268_vm0, %v267_v0  ;;  %v54_v3 = vld [vmem:[#allocation5 + $0x28] sm:$0xff]  ;;  %v41_v4 = vld [vmem:[#allocation2] sm:$0x3]  ;;  %v53_v6 = vld [vmem:[#allocation5 + $0x20] sm:$0xff]  ;;  %vm64_vm1 = vcmask 523264   ;;  %s269_s24 = smov [#allocation7]  }
  0x1c   :  { %168 = vmatpush3.msra.mxu0 %v56_v1  ;;  %v42_v5 = vsub.f32 0.0, %v41_v4  ;;  %v52_v8 = vld [vmem:[#allocation5 + $0x18] sm:$0xff]  ;;  %v51_v9 = vld [vmem:[#allocation5 + $0x10] sm:$0xff]  ;;  %v50_v10 = vld [vmem:[#allocation5 + $0x8] sm:$0xff]  ;;  %s146_s25 = sshll.u32 %s269_s24, 4  ;;  %vm138_vm2 = vcmask 517120   ;;  %s147_s25 = int_to_ptr.vmem [resolvable:$true] %s146_s25 }
  0x1d   :  { %169 = vmatprep.subr.mxu0 %v267_v0  ;;  %v49_v11 = vld [vmem:[#allocation5] sm:$0xff]  ;;  %v156_v16 = vld [vmem:[%s304_s2] ss:$0 sm:$0xff]  ;;  %s237_s26 = scalar_lea.vmem %s147_s25, 32  ;;  %p242_p11 = scmp.lt.s32.totalorder %s147_s25, %s147_s25 }
  0x1e   :  { %170 = vmatpush3.msra.mxu0 %v55_v2  ;;  %v43_v7 = vmul.f32 1.442695, %v42_v5  ;;  %p238_p10 = scmp.ne.s32.totalorder %s147_s25, %s237_s26  ;;  %p243_p12 = scmp.lt.s32.totalorder %s237_s26, %s237_s26 }
  0x1f   :  { %171 = vmatprep.subr.mxu0 %v267_v0 }
  0x20   :  { %172 = vmatpush3.msra.mxu0 %v54_v3  ;;  %193 = vpow2.f32 %v43_v7  ;;  %p244_p13 = por %p243_p12, %p242_p11 }
  0x21   :  { %173 = vmatprep.subr.mxu0 %v267_v0 }
  0x22   :  { %174 = vmatpush3.msra.mxu0 %v53_v6  ;;  %p245_p0 = pnand %p244_p13, %p238_p10 }
  0x23   :  { %175 = vmatprep.subr.mxu0 %v267_v0 }
  0x24   :  { %176 = vmatpush3.msra.mxu0 %v52_v8 }
  0x25   :  { %177 = vmatprep.subr.mxu0 %v267_v0 }
  0x26   :  { %178 = vmatpush3.msra.mxu0 %v51_v9 }
  0x27   :  { %179 = vmatprep.subr.mxu0 %v267_v0 }
  0x28   :  { %180 = vmatpush3.msra.mxu0 %v50_v10 }
  0x29   :  { %181 = vmatprep.subr.mxu0 %v267_v0 }
  0x2a   :  { %182 = vmatpush3.msra.mxu0 %v49_v11 }
  0x2d   :  { %v194_v12 = vpop.eup %193 }
  0x2e   :  { %v45_v13 = vadd.f32 1.0, %v194_v12 }
  0x30   :  { %195 = vrcp.f32 %v45_v13 }
  0x3d   :  { %v196_v14 = vpop.eup %195 }
  0x3e   :  { %v48_v15 = vmul.f32 %v196_v14, %v41_v4 }
  0x40   :  { %184 = vmatmul.mubr.msk.f32.vlgmr.msra.gmra.mxu0 %vm64_vm1, %v48_v15 }
 0x100   :  { %v134_v17 = vpop.f32.mrf.mxu0 }
 0x101   :  { %v135_v18 = vadd.f32 %v156_v16, %v134_v17 }
 0x102   :  { %v185_v19 = vpop.f32.mrf.mxu0 }
 0x103   :  { %139 = vst.msk [vmem:[#allocation7] sm:$0x3] %vm138_vm2, %v135_v18 }
 0x104   :  { %248 = shalt.err (!%p245_p0)
}
 0x105   :  { %149 = dma.vmem_to_hbm [thread:$0]  %s147_s25, 32, %s305_s3, [#allocation4]  }
 0x106   :  { %261 = dma.done.wait [#allocation4], 32  }
 0x107   :  { %262 = vsyncadd [#allocation4], 4294967264 }
 0x108   :  { %153 = vsyncpa [#allocation3], 1 }
 0x109   :  { %154 = vsyncpa [#allocation6], 1 }
 0x10a   :  { %155 = vsyncpa [#allocation4], 1 }

</bundles_post_ra>
